<compile_context>
chip_gen: v7x
topology: tpu7x:2x2x1
jax: 0.10.0
libtpu: 0.0.40
codegen_flags: <defaults>
</compile_context>

<pallas_src>
import jax
import jax.numpy as jnp
from jax.experimental import pallas as pl
from jax.experimental.pallas import tpu as pltpu

H = 64          # input_dim == hidden_dim (module default)
L = 3           # LSTM num_layers
N_FEAT = 1      # n_features
G = 4 * H       # gate width (PyTorch order [i, f, g, o])

# ---- f32 aux slab, shape (8, G) -------------------------------------------------
_AUX_WIH0 = 0       # W_ih layer0 transposed, gate-prescaled            (1, G)
_AUX_B = 1          # rows 1..3: combined (b_ih + b_hh), gate-prescaled (L, G)
_AUX_GSCALE = 4     # post-tanh per-lane scale  [0.5 | 0.5 | 1 | 0.5]
_AUX_GOFF = 5       # post-tanh per-lane offset [0.5 | 0.5 | 0 | 0.5]
_AUX_WOUT = 6       # W_out padded to G lanes (first H real)
_AUX_ROWS = 8

# ---- bf16 matrix slab, shape (5H, G): pre-transposed, gate-prescaled ------------
_W_HH0 = 0 * H
_W_HH1 = 1 * H
_W_HH2 = 2 * H
_W_IH1 = 3 * H
_W_IH2 = 4 * H
_SLAB_ROWS = 5 * H   # 320 rows (multiple of the bf16 (16,128) sublane tile)


def _decoder_kernel(x_ref, const_ref, state_ref, aux_ref, w_ref, out_ref):
    # x_ref    : SMEM (1,)              per-step scalar input x
    # const_ref: SMEM (1,)              output-layer bias b_out (packed once)
    # state_ref: VMEM (L, 2H)           row l = [h_prev_l | c_prev_l]
    # aux_ref  : VMEM (8, G) f32        biases / constants (see layout above)
    # w_ref    : VMEM (5H, G) bf16      [W_hh0|W_hh1|W_hh2|W_ih1|W_ih2]^T prescaled
    # out_ref  : VMEM (L+1, 2H)         rows 0..2 = [h_new | c_new], row 3 = bcast(y)
    x = x_ref[0]
    b_out = const_ref[0]

    gscale = aux_ref[_AUX_GSCALE:_AUX_GSCALE + 1, :]
    goff = aux_ref[_AUX_GOFF:_AUX_GOFF + 1, :]
    wout = aux_ref[_AUX_WOUT:_AUX_WOUT + 1, 0:H]

    lane = jax.lax.broadcasted_iota(jnp.int32, (1, 2 * H), 1)
    lo_mask = lane < H

    s0 = state_ref[0:1, :]
    s1 = state_ref[1:2, :]
    s2 = state_ref[2:3, :]

    # --- hoisted work: depends only on the *input* state and x --------------------
    # Three back-to-back MXU dots (they pipeline and drain under layer-0 compute);
    # the serial layer-to-layer chain only carries the gx dots below.
    hhb0 = jnp.dot(s0[:, 0:H].astype(jnp.bfloat16), w_ref[_W_HH0:_W_HH0 + H, :],
                   preferred_element_type=jnp.float32) + aux_ref[_AUX_B + 0:_AUX_B + 1, :]
    hhb1 = jnp.dot(s1[:, 0:H].astype(jnp.bfloat16), w_ref[_W_HH1:_W_HH1 + H, :],
                   preferred_element_type=jnp.float32) + aux_ref[_AUX_B + 1:_AUX_B + 2, :]
    hhb2 = jnp.dot(s2[:, 0:H].astype(jnp.bfloat16), w_ref[_W_HH2:_W_HH2 + H, :],
                   preferred_element_type=jnp.float32) + aux_ref[_AUX_B + 2:_AUX_B + 3, :]
    # Layer-0 input has size 1 -> scalar * row on the VPU, no MXU needed.
    gx0 = x * aux_ref[_AUX_WIH0:_AUX_WIH0 + 1, :]

    def cell(z, state_prev):
        # z: (1, 4H) pre-activations with i/f/o columns pre-scaled by 0.5.
        # One full-width tanh; sigmoid recovered as 0.5*tanh(z/2)+0.5 (g = tanh(z)).
        gates = jnp.tanh(z) * gscale + goff            # [ i | f | g | o ]
        a_if = gates[:, 0:2 * H]                       # [ i | f ]  (vreg-aligned)
        b_go = gates[:, 2 * H:4 * H]                   # [ g | o ]  (vreg-aligned)
        p_ig = a_if * b_go                             # [ i*g     | f*o      ]
        p_hc = a_if * state_prev                       # [ i*h_prv | f*c_prev ]
        s_new = p_hc + pltpu.roll(p_ig, shift=H, axis=1)   # lanes H..2H-1 = c_new
        t_new = b_go * jnp.tanh(s_new)                     # lanes H..2H-1 = h_new
        h_lo = pltpu.roll(t_new, shift=H, axis=1)          # lanes 0..H-1  = h_new
        state_new = jnp.where(lo_mask, h_lo, s_new)        # [ h_new | c_new ]
        return state_new, h_lo

    # Layer 0
    st0, hlo0 = cell(gx0 + hhb0, s0)
    out_ref[0:1, :] = st0                              # direct row store (no concat)

    # Layer 1
    gx1 = jnp.dot(hlo0[:, 0:H].astype(jnp.bfloat16), w_ref[_W_IH1:_W_IH1 + H, :],
                  preferred_element_type=jnp.float32)
    st1, hlo1 = cell(gx1 + hhb1, s1)
    out_ref[1:2, :] = st1

    # Layer 2
    gx2 = jnp.dot(hlo1[:, 0:H].astype(jnp.bfloat16), w_ref[_W_IH2:_W_IH2 + H, :],
                  preferred_element_type=jnp.float32)
    st2, hlo2 = cell(gx2 + hhb2, s2)
    out_ref[2:3, :] = st2

    # Output head: VPU multiply + lane reduction (no N=1 MXU push/pop round-trip).
    y = jnp.sum(hlo2[:, 0:H] * wout, axis=-1, keepdims=True) + b_out   # (1, 1)
    out_ref[3:4, :] = jnp.broadcast_to(y, (1, 2 * H))


def init_params(key):
    """Deterministic init mimicking PyTorch LSTM/Linear layouts (uniform(-k, k), k=1/sqrt(H))."""
    k = 1.0 / jnp.sqrt(jnp.float32(H))
    keys = jax.random.split(key, 4 * L + 2)
    params = {}
    kk = 0
    for l in range(L):
        in_dim = 1 if l == 0 else H
        params[f"w_ih_{l}"] = jax.random.uniform(keys[kk], (4 * H, in_dim), jnp.float32, -k, k); kk += 1
        params[f"w_hh_{l}"] = jax.random.uniform(keys[kk], (4 * H, H), jnp.float32, -k, k); kk += 1
        params[f"b_ih_{l}"] = jax.random.uniform(keys[kk], (4 * H,), jnp.float32, -k, k); kk += 1
        params[f"b_hh_{l}"] = jax.random.uniform(keys[kk], (4 * H,), jnp.float32, -k, k); kk += 1
    params["w_out"] = jax.random.uniform(keys[kk], (N_FEAT, H), jnp.float32, -k, k); kk += 1
    params["b_out"] = jax.random.uniform(keys[kk], (N_FEAT,), jnp.float32, -k, k); kk += 1
    return params


def pack_weights(params):
    """Pre-transpose / pre-scale / pack all weights.  Call ONCE at param-load time
    (hoisted off the per-step path); the results are reused by every forward call."""
    # Pre-activation scale: i/f/o columns x0.5 (sigmoid via tanh), g column x1.
    s = jnp.concatenate([jnp.full((2 * H,), 0.5, jnp.float32),
                         jnp.ones((H,), jnp.float32),
                         jnp.full((H,), 0.5, jnp.float32)])
    goff = jnp.concatenate([jnp.full((2 * H,), 0.5, jnp.float32),
                            jnp.zeros((H,), jnp.float32),
                            jnp.full((H,), 0.5, jnp.float32)])

    def prescale(w_t):                       # w_t: (K, G)
        return w_t.astype(jnp.float32) * s[None, :]

    # f32 aux slab.
    wih0 = prescale(params["w_ih_0"].T)                               # (1, G)
    b_rows = [prescale((params[f"b_ih_{l}"] + params[f"b_hh_{l}"])[None, :])
              for l in range(L)]                                      # 3 x (1, G)
    wout_row = jnp.pad(params["w_out"].astype(jnp.float32),
                       ((0, 0), (0, G - H)))                          # (1, G)
    pad = jnp.zeros((_AUX_ROWS - 7, G), jnp.float32)
    aux = jnp.concatenate([wih0] + b_rows
                          + [s[None, :], goff[None, :], wout_row, pad], axis=0)
    assert aux.shape == (_AUX_ROWS, G)

    # bf16 matrix slab (the big data mover): W_hh0..2^T then W_ih1..2^T.
    mats = [params["w_hh_0"].T, params["w_hh_1"].T, params["w_hh_2"].T,
            params["w_ih_1"].T, params["w_ih_2"].T]
    slab = jnp.concatenate([prescale(m) for m in mats], axis=0).astype(jnp.bfloat16)
    assert slab.shape == (_SLAB_ROWS, G)

    consts = params["b_out"].reshape((1,)).astype(jnp.float32)
    return consts, aux, slab


_FLOPS = 2 * 5 * H * G + 12 * L * 2 * H + 2 * G + 4 * H
_TRANS = L * (G + 2 * H)
_BYTES = (_SLAB_ROWS * G * 2 + _AUX_ROWS * G * 4
          + L * 2 * H * 4 + (L + 1) * 2 * H * 4 + 8)


@jax.jit
def decoder_forward(x, input_hidden, input_cell, consts, aux, slab):
    """Mirrors Decoder.forward (single step): returns (y, hidden_n, cell_n).
    `consts/aux/slab` come from pack_weights(params), computed once."""
    x_arr = jnp.reshape(x, (1,)).astype(jnp.float32)
    h0 = jnp.reshape(input_hidden, (L, H)).astype(jnp.float32)
    c0 = jnp.reshape(input_cell, (L, H)).astype(jnp.float32)
    state = jnp.concatenate([h0, c0], axis=-1)                  # (L, 2H) lane-dense

    out = pl.pallas_call(
        _decoder_kernel,
        out_shape=jax.ShapeDtypeStruct((L + 1, 2 * H), jnp.float32),
        in_specs=[pl.BlockSpec(memory_space=pltpu.MemorySpace.SMEM),
                  pl.BlockSpec(memory_space=pltpu.MemorySpace.SMEM),
                  pl.BlockSpec(memory_space=pltpu.MemorySpace.VMEM),
                  pl.BlockSpec(memory_space=pltpu.MemorySpace.VMEM),
                  pl.BlockSpec(memory_space=pltpu.MemorySpace.VMEM)],
        out_specs=pl.BlockSpec(memory_space=pltpu.MemorySpace.VMEM),
        cost_estimate=pl.CostEstimate(flops=_FLOPS, transcendentals=_TRANS,
                                      bytes_accessed=_BYTES),
    )(x_arr, consts, state, aux, slab)

    hn = out[0:L, 0:H].reshape(L, 1, H)
    cn = out[0:L, H:2 * H].reshape(L, 1, H)
    y = out[L, 0].reshape(1, 1, N_FEAT)
    return y, hn, cn


def decoder_reference(x, input_hidden, input_cell, params):
    """Pure-JAX reference matching PyTorch LSTM semantics (single step, eval mode)."""
    xt = jnp.reshape(x, (1, 1)).astype(jnp.float32)
    h0 = jnp.reshape(input_hidden, (L, H)).astype(jnp.float32)
    c0 = jnp.reshape(input_cell, (L, H)).astype(jnp.float32)
    inp = xt
    hs, cs = [], []
    for l in range(L):
        gates = (inp @ params[f"w_ih_{l}"].T + params[f"b_ih_{l}"]
                 + h0[l:l + 1] @ params[f"w_hh_{l}"].T + params[f"b_hh_{l}"])
        i = jax.nn.sigmoid(gates[:, 0 * H:1 * H])
        f = jax.nn.sigmoid(gates[:, 1 * H:2 * H])
        g = jnp.tanh(gates[:, 2 * H:3 * H])
        o = jax.nn.sigmoid(gates[:, 3 * H:4 * H])
        c = f * c0[l:l + 1] + i * g
        h = o * jnp.tanh(c)
        hs.append(h); cs.append(c)
        inp = h
    y = inp @ params["w_out"].T + params["b_out"]
    return (y.reshape(1, 1, N_FEAT),
            jnp.concatenate(hs, 0).reshape(L, 1, H),
            jnp.concatenate(cs, 0).reshape(L, 1, H))


if __name__ == "__main__":
    key = jax.random.PRNGKey(0)
    kp, kx, kh, kc = jax.random.split(key, 4)
    params = init_params(kp)

    # Weight packing happens ONCE here (not per forward call).
    consts, aux, slab = pack_weights(params)
    consts, aux, slab = jax.device_put((consts, aux, slab))

    x = jax.random.normal(kx, (1,), jnp.float32)            # reshaped to (1,1,1) inside forward
    input_hidden = jax.random.normal(kh, (L, 1, H), jnp.float32)
    input_cell = jax.random.normal(kc, (L, 1, H), jnp.float32)

    y, hn, cn = decoder_forward(x, input_hidden, input_cell, consts, aux, slab)
    jax.block_until_ready((y, hn, cn))

    y_r, hn_r, cn_r = decoder_reference(x, input_hidden, input_cell, params)
    # Tolerance loosened vs. the f32 reference because the matrix slab is bf16.
    assert jnp.allclose(y, y_r, atol=2e-2, rtol=2e-2), "output mismatch"
    assert jnp.allclose(hn, hn_r, atol=2e-2, rtol=2e-2), "hidden mismatch"
    assert jnp.allclose(cn, cn_r, atol=2e-2, rtol=2e-2), "cell mismatch"

    print("KERNEL_OK")
</pallas_src>

<mosaic_0001>
module attributes {stable_mosaic.version = 11 : i64} {
  func.func @_decoder_kernel(%arg0: memref<1xf32, #tpu.memory_space<smem>>, %arg1: memref<1xf32, #tpu.memory_space<smem>>, %arg2: memref<3x128xf32, #tpu.memory_space<vmem>>, %arg3: memref<8x256xf32, #tpu.memory_space<vmem>>, %arg4: memref<320x256xbf16, #tpu.memory_space<vmem>>, %arg5: memref<4x128xf32, #tpu.memory_space<vmem>>) attributes {dimension_semantics = [], scalar_prefetch = 0 : i64, scratch_operands = 0 : i64, tpu.core_type = #tpu.core_type<tc>} {
    %c0 = arith.constant 0 : index
    %0 = memref.load %arg0[%c0] : memref<1xf32, #tpu.memory_space<smem>>
    %c0_0 = arith.constant 0 : index
    %1 = memref.load %arg1[%c0_0] : memref<1xf32, #tpu.memory_space<smem>>
    %c4 = arith.constant 4 : index
    %c0_1 = arith.constant 0 : index
    %2 = vector.load %arg3[%c4, %c0_1] : memref<8x256xf32, #tpu.memory_space<vmem>>, vector<1x256xf32>
    %c5 = arith.constant 5 : index
    %c0_2 = arith.constant 0 : index
    %3 = vector.load %arg3[%c5, %c0_2] : memref<8x256xf32, #tpu.memory_space<vmem>>, vector<1x256xf32>
    %c6 = arith.constant 6 : index
    %c0_3 = arith.constant 0 : index
    %4 = vector.load %arg3[%c6, %c0_3] : memref<8x256xf32, #tpu.memory_space<vmem>>, vector<1x64xf32>
    %5 = tpu.iota {dimensions = array<i32: 1>} : vector<1x128xi32>
    %c64_i32 = arith.constant 64 : i32
    %6 = vector.broadcast %c64_i32 : i32 to vector<1x128xi32>
    %7 = arith.cmpi slt, %5, %6 : vector<1x128xi32>
    %c0_4 = arith.constant 0 : index
    %c0_5 = arith.constant 0 : index
    %8 = vector.load %arg2[%c0_4, %c0_5] : memref<3x128xf32, #tpu.memory_space<vmem>>, vector<1x128xf32>
    %c1 = arith.constant 1 : index
    %c0_6 = arith.constant 0 : index
    %9 = vector.load %arg2[%c1, %c0_6] : memref<3x128xf32, #tpu.memory_space<vmem>>, vector<1x128xf32>
    %c2 = arith.constant 2 : index
    %c0_7 = arith.constant 0 : index
    %10 = vector.load %arg2[%c2, %c0_7] : memref<3x128xf32, #tpu.memory_space<vmem>>, vector<1x128xf32>
    %11 = vector.extract_strided_slice %8 {offsets = [0, 0], sizes = [1, 64], strides = [1, 1]} : vector<1x128xf32> to vector<1x64xf32>
    %12 = arith.truncf %11 : vector<1x64xf32> to vector<1x64xbf16>
    %c0_8 = arith.constant 0 : index
    %c0_9 = arith.constant 0 : index
    %13 = vector.load %arg4[%c0_8, %c0_9] : memref<320x256xbf16, #tpu.memory_space<vmem>>, vector<64x256xbf16>
    %cst = arith.constant dense<0.000000e+00> : vector<1x256xf32>
    %14 = tpu.matmul %12, %13, %cst {dimension_numbers = #tpu.dot_dimension_numbers<[1], [0], [0], [1], [0, 0, 1, 1], [], []>} : vector<1x64xbf16>, vector<64x256xbf16>, vector<1x256xf32> -> vector<1x256xf32>
    %c1_10 = arith.constant 1 : index
    %c0_11 = arith.constant 0 : index
    %15 = vector.load %arg3[%c1_10, %c0_11] : memref<8x256xf32, #tpu.memory_space<vmem>>, vector<1x256xf32>
    %16 = arith.addf %14, %15 : vector<1x256xf32>
    %17 = vector.extract_strided_slice %9 {offsets = [0, 0], sizes = [1, 64], strides = [1, 1]} : vector<1x128xf32> to vector<1x64xf32>
    %18 = arith.truncf %17 : vector<1x64xf32> to vector<1x64xbf16>
    %c64 = arith.constant 64 : index
    %c0_12 = arith.constant 0 : index
    %19 = vector.load %arg4[%c64, %c0_12] : memref<320x256xbf16, #tpu.memory_space<vmem>>, vector<64x256xbf16>
    %cst_13 = arith.constant dense<0.000000e+00> : vector<1x256xf32>
    %20 = tpu.matmul %18, %19, %cst_13 {dimension_numbers = #tpu.dot_dimension_numbers<[1], [0], [0], [1], [0, 0, 1, 1], [], []>} : vector<1x64xbf16>, vector<64x256xbf16>, vector<1x256xf32> -> vector<1x256xf32>
    %c2_14 = arith.constant 2 : index
    %c0_15 = arith.constant 0 : index
    %21 = vector.load %arg3[%c2_14, %c0_15] : memref<8x256xf32, #tpu.memory_space<vmem>>, vector<1x256xf32>
    %22 = arith.addf %20, %21 : vector<1x256xf32>
    %23 = vector.extract_strided_slice %10 {offsets = [0, 0], sizes = [1, 64], strides = [1, 1]} : vector<1x128xf32> to vector<1x64xf32>
    %24 = arith.truncf %23 : vector<1x64xf32> to vector<1x64xbf16>
    %c128 = arith.constant 128 : index
    %c0_16 = arith.constant 0 : index
    %25 = vector.load %arg4[%c128, %c0_16] : memref<320x256xbf16, #tpu.memory_space<vmem>>, vector<64x256xbf16>
    %cst_17 = arith.constant dense<0.000000e+00> : vector<1x256xf32>
    %26 = tpu.matmul %24, %25, %cst_17 {dimension_numbers = #tpu.dot_dimension_numbers<[1], [0], [0], [1], [0, 0, 1, 1], [], []>} : vector<1x64xbf16>, vector<64x256xbf16>, vector<1x256xf32> -> vector<1x256xf32>
    %c3 = arith.constant 3 : index
    %c0_18 = arith.constant 0 : index
    %27 = vector.load %arg3[%c3, %c0_18] : memref<8x256xf32, #tpu.memory_space<vmem>>, vector<1x256xf32>
    %28 = arith.addf %26, %27 : vector<1x256xf32>
    %c0_19 = arith.constant 0 : index
    %c0_20 = arith.constant 0 : index
    %29 = vector.load %arg3[%c0_19, %c0_20] : memref<8x256xf32, #tpu.memory_space<vmem>>, vector<1x256xf32>
    %30 = vector.broadcast %0 : f32 to vector<1x256xf32>
    %31 = arith.mulf %30, %29 : vector<1x256xf32>
    %32 = arith.addf %31, %16 : vector<1x256xf32>
    %33 = math.tanh %32 : vector<1x256xf32>
    %34 = arith.mulf %33, %2 : vector<1x256xf32>
    %35 = arith.addf %34, %3 : vector<1x256xf32>
    %36 = vector.extract_strided_slice %35 {offsets = [0, 0], sizes = [1, 128], strides = [1, 1]} : vector<1x256xf32> to vector<1x128xf32>
    %37 = vector.extract_strided_slice %35 {offsets = [0, 128], sizes = [1, 128], strides = [1, 1]} : vector<1x256xf32> to vector<1x128xf32>
    %38 = arith.mulf %36, %37 : vector<1x128xf32>
    %39 = arith.mulf %36, %8 : vector<1x128xf32>
    %c64_i32_21 = arith.constant 64 : i32
    %40 = tpu.dynamic_rotate %38 by %c64_i32_21 dim 1 : vector<1x128xf32>, i32 -> vector<1x128xf32>
    %41 = arith.addf %39, %40 : vector<1x128xf32>
    %42 = math.tanh %41 : vector<1x128xf32>
    %43 = arith.mulf %37, %42 : vector<1x128xf32>
    %c64_i32_22 = arith.constant 64 : i32
    %44 = tpu.dynamic_rotate %43 by %c64_i32_22 dim 1 : vector<1x128xf32>, i32 -> vector<1x128xf32>
    %45 = arith.select %7, %44, %41 : vector<1x128xi1>, vector<1x128xf32>
    %c0_23 = arith.constant 0 : index
    %c0_24 = arith.constant 0 : index
    %46 = vector.load %arg5[%c0_23, %c0_24] : memref<4x128xf32, #tpu.memory_space<vmem>>, vector<1x128xf32>
    tpu.vector_store %arg5[%c0_23, %c0_24], %45 {strides = array<i32>} : memref<4x128xf32, #tpu.memory_space<vmem>>, vector<1x128xf32>,
    %47 = vector.extract_strided_slice %44 {offsets = [0, 0], sizes = [1, 64], strides = [1, 1]} : vector<1x128xf32> to vector<1x64xf32>
    %48 = arith.truncf %47 : vector<1x64xf32> to vector<1x64xbf16>
    %c192 = arith.constant 192 : index
    %c0_25 = arith.constant 0 : index
    %49 = vector.load %arg4[%c192, %c0_25] : memref<320x256xbf16, #tpu.memory_space<vmem>>, vector<64x256xbf16>
    %cst_26 = arith.constant dense<0.000000e+00> : vector<1x256xf32>
    %50 = tpu.matmul %48, %49, %cst_26 {dimension_numbers = #tpu.dot_dimension_numbers<[1], [0], [0], [1], [0, 0, 1, 1], [], []>} : vector<1x64xbf16>, vector<64x256xbf16>, vector<1x256xf32> -> vector<1x256xf32>
    %51 = arith.addf %50, %22 : vector<1x256xf32>
    %52 = math.tanh %51 : vector<1x256xf32>
    %53 = arith.mulf %52, %2 : vector<1x256xf32>
    %54 = arith.addf %53, %3 : vector<1x256xf32>
    %55 = vector.extract_strided_slice %54 {offsets = [0, 0], sizes = [1, 128], strides = [1, 1]} : vector<1x256xf32> to vector<1x128xf32>
    %56 = vector.extract_strided_slice %54 {offsets = [0, 128], sizes = [1, 128], strides = [1, 1]} : vector<1x256xf32> to vector<1x128xf32>
    %57 = arith.mulf %55, %56 : vector<1x128xf32>
    %58 = arith.mulf %55, %9 : vector<1x128xf32>
    %c64_i32_27 = arith.constant 64 : i32
    %59 = tpu.dynamic_rotate %57 by %c64_i32_27 dim 1 : vector<1x128xf32>, i32 -> vector<1x128xf32>
    %60 = arith.addf %58, %59 : vector<1x128xf32>
    %61 = math.tanh %60 : vector<1x128xf32>
    %62 = arith.mulf %56, %61 : vector<1x128xf32>
    %c64_i32_28 = arith.constant 64 : i32
    %63 = tpu.dynamic_rotate %62 by %c64_i32_28 dim 1 : vector<1x128xf32>, i32 -> vector<1x128xf32>
    %64 = arith.select %7, %63, %60 : vector<1x128xi1>, vector<1x128xf32>
    %c1_29 = arith.constant 1 : index
    %c0_30 = arith.constant 0 : index
    %65 = vector.load %arg5[%c1_29, %c0_30] : memref<4x128xf32, #tpu.memory_space<vmem>>, vector<1x128xf32>
    tpu.vector_store %arg5[%c1_29, %c0_30], %64 {strides = array<i32>} : memref<4x128xf32, #tpu.memory_space<vmem>>, vector<1x128xf32>,
    %66 = vector.extract_strided_slice %63 {offsets = [0, 0], sizes = [1, 64], strides = [1, 1]} : vector<1x128xf32> to vector<1x64xf32>
    %67 = arith.truncf %66 : vector<1x64xf32> to vector<1x64xbf16>
    %c256 = arith.constant 256 : index
    %c0_31 = arith.constant 0 : index
    %68 = vector.load %arg4[%c256, %c0_31] : memref<320x256xbf16, #tpu.memory_space<vmem>>, vector<64x256xbf16>
    %cst_32 = arith.constant dense<0.000000e+00> : vector<1x256xf32>
    %69 = tpu.matmul %67, %68, %cst_32 {dimension_numbers = #tpu.dot_dimension_numbers<[1], [0], [0], [1], [0, 0, 1, 1], [], []>} : vector<1x64xbf16>, vector<64x256xbf16>, vector<1x256xf32> -> vector<1x256xf32>
    %70 = arith.addf %69, %28 : vector<1x256xf32>
    %71 = math.tanh %70 : vector<1x256xf32>
    %72 = arith.mulf %71, %2 : vector<1x256xf32>
    %73 = arith.addf %72, %3 : vector<1x256xf32>
    %74 = vector.extract_strided_slice %73 {offsets = [0, 0], sizes = [1, 128], strides = [1, 1]} : vector<1x256xf32> to vector<1x128xf32>
    %75 = vector.extract_strided_slice %73 {offsets = [0, 128], sizes = [1, 128], strides = [1, 1]} : vector<1x256xf32> to vector<1x128xf32>
    %76 = arith.mulf %74, %75 : vector<1x128xf32>
    %77 = arith.mulf %74, %10 : vector<1x128xf32>
    %c64_i32_33 = arith.constant 64 : i32
    %78 = tpu.dynamic_rotate %76 by %c64_i32_33 dim 1 : vector<1x128xf32>, i32 -> vector<1x128xf32>
    %79 = arith.addf %77, %78 : vector<1x128xf32>
    %80 = math.tanh %79 : vector<1x128xf32>
    %81 = arith.mulf %75, %80 : vector<1x128xf32>
    %c64_i32_34 = arith.constant 64 : i32
    %82 = tpu.dynamic_rotate %81 by %c64_i32_34 dim 1 : vector<1x128xf32>, i32 -> vector<1x128xf32>
    %83 = arith.select %7, %82, %79 : vector<1x128xi1>, vector<1x128xf32>
    %c2_35 = arith.constant 2 : index
    %c0_36 = arith.constant 0 : index
    %84 = vector.load %arg5[%c2_35, %c0_36] : memref<4x128xf32, #tpu.memory_space<vmem>>, vector<1x128xf32>
    tpu.vector_store %arg5[%c2_35, %c0_36], %83 {strides = array<i32>} : memref<4x128xf32, #tpu.memory_space<vmem>>, vector<1x128xf32>,
    %85 = vector.extract_strided_slice %82 {offsets = [0, 0], sizes = [1, 64], strides = [1, 1]} : vector<1x128xf32> to vector<1x64xf32>
    %86 = arith.mulf %85, %4 : vector<1x64xf32>
    %cst_37 = arith.constant dense<0.000000e+00> : vector<1xf32>
    %87 = vector.multi_reduction <add>, %86, %cst_37 [1] : vector<1x64xf32> to vector<1xf32>
    %88 = vector.shape_cast %87 : vector<1xf32> to vector<1x1xf32>
    %89 = vector.broadcast %1 : f32 to vector<1x1xf32>
    %90 = arith.addf %88, %89 : vector<1x1xf32>
    %91 = vector.shape_cast %90 : vector<1x1xf32> to vector<1x1xf32>
    %92 = vector.broadcast %91 : vector<1x1xf32> to vector<1x128xf32>
    %c3_38 = arith.constant 3 : index
    %c0_39 = arith.constant 0 : index
    %93 = vector.load %arg5[%c3_38, %c0_39] : memref<4x128xf32, #tpu.memory_space<vmem>>, vector<1x128xf32>
    tpu.vector_store %arg5[%c3_38, %c0_39], %92 {strides = array<i32>} : memref<4x128xf32, #tpu.memory_space<vmem>>, vector<1x128xf32>,
    return
  }
}

</mosaic_0001>

<bundles_post_ra>
// kernel: decoder_forward.1
= control target key start
LH: loop header
LB: loop body
LE: loop exit
PB: predicated region body
PF: predicated region fallthrough
CT: control target
= control target key end

     0   :  { %12 = vsyncpa [#allocation5], 0  ;;  %s831_s18 = smov [#allocation4]   ;;  %s1004_s0 = inlined_call_operand.<no memory space> [shape: f32[1], index: 0, kind: input, shape index: {}]   ;;  %s1005_s1 = inlined_call_operand.<no memory space> [shape: f32[1], index: 1, kind: input, shape index: {}]   ;;  %s1006_s2 = inlined_call_operand.vmem [shape: f32[3,128], index: 2, kind: input, shape index: {}]   ;;  %s1007_s3 = inlined_call_operand.vmem [shape: f32[8,256], index: 3, kind: input, shape index: {}]   ;;  %s1008_s4 = inlined_call_operand.hbm [shape: bf16[320,256], index: 4, kind: input, shape index: {}]   ;;  %s1009_s5 = inlined_call_operand.vmem [shape: f32[4,128], index: 5, kind: output, shape index: {}]  }
   0x1   :  { %s26_s19 = sshll.u32 %s831_s18, 4  ;;  %s807_s22 = scalar_lea.hbm %s1008_s4, 5120  ;;  %s27_s19 = int_to_ptr.vmem [resolvable:$true] %s26_s19 }
   0x2   :  { %p808_p0 = scmp.ne.s32.totalorder %s1008_s4, %s807_s22  ;;  %p811_p1 = scmp.lt.u32.totalorder %s807_s22, %s1008_s4 }
   0x4   :  { %p813_p2 = pnand %p811_p1, %p808_p0 }
   0x6   :  { %816 = shalt.err (!%p813_p2)
}
   0x7   :  { %s817_s27 = scalar_lea.vmem %s27_s19, 5120  ;;  %p822_p4 = scmp.lt.s32.totalorder %s27_s19, %s27_s19 }
   0x8   :  { %p818_p3 = scmp.ne.s32.totalorder %s27_s19, %s817_s27  ;;  %p823_p5 = scmp.lt.s32.totalorder %s817_s27, %s817_s27 }
   0xa   :  { %p824_p6 = por %p823_p5, %p822_p4 }
   0xc   :  { %p825_p7 = pnand %p824_p6, %p818_p3 }
   0xe   :  { %828 = shalt.err (!%p825_p7)
}
   0xf   :  { %s832_s28 = smov 128   ;;  %s833_s29 = smov 8  }
  0x10   :  { %32 = dma.hbm_to_vmem [thread:$0]  %s1008_s4, 5120, %s27_s19, [#allocation5], %s832_s28, %s832_s28, %s833_s29  }
  0x11   :  { %829 = dma.done.wait [#allocation5], 5120  }
  0x12   :  { %830 = vsyncadd [#allocation5], 4294962176  ;;  %v834_v0 = vmov 0   ;;  %v731_v1 = vld [vmem:[#allocation4 + $0x4] ss:$8 sps:$4 sm:$0xff]   ;;  %vm112_vm0 = vcmask 523264   ;;  %v44_v11 = vlaneseq  ;;  %v370_v28 = vstv %s1004_s0 }
  0x13   :  { %148 = vmatprep.mubr.bf16.mxu0 %v834_v0  ;;  %254 = vmatprep.mubr.bf16.mxu1 %v834_v0  ;;  %v733_v2 = vld [vmem:[#allocation4] ss:$8 sps:$4 sm:$0xff]   ;;  %v734_v3 = vld [vmem:[#allocation4 + $0x14] ss:$8 sps:$4 sm:$0xff]   ;;  %v736_v4 = vld [vmem:[#allocation4 + $0x10] ss:$8 sps:$4 sm:$0xff]  }
  0x14   :  { %116 = vmatprep.subr.bf16.mxu0 %v731_v1  ;;  %v737_v5 = vld [vmem:[#allocation4 + $0x24] ss:$8 sps:$4 sm:$0xff]   ;;  %v739_v6 = vld [vmem:[#allocation4 + $0x20] ss:$8 sps:$4 sm:$0xff]   ;;  %v740_v7 = vld [vmem:[#allocation4 + $0x34] ss:$8 sps:$4 sm:$0xff]  }
  0x15   :  { %117 = vmatpush1.bf16.msra.mxu0 %v733_v2  ;;  %v742_v8 = vld [vmem:[#allocation4 + $0x30] ss:$8 sps:$4 sm:$0xff]   ;;  %v884_v9 = vld [vmem:[%s1006_s2] sm:$0x1]  ;;  %v103_v12 = vshrl.u32 %v44_v11, 7  ;;  %s836_s0 = smov 64  }
  0x16   :  { %118 = vmatprep.subr.bf16.mxu0 %v734_v3  ;;  %v50_v10 = vpack.c.bf16 %v884_v9, %v884_v9  ;;  %v665_v14 = vld [vmem:[%s1007_s3 + $0x1] ss:$8 sm:$0x3]  ;;  %v835_v16 = vmov 1966171168   ;;  %v931_v2 = vand.u32 127, %v44_v11 }
  0x17   :  { %v891_v13 = vsub.s32 0, %v103_v12  ;;  %v896_v15 = vsub.s32 1, %v103_v12  ;;  %v376_v17 = vunpack.c.l.s4 %v835_v16  ;;  %v369_v27 = vld [vmem:[%s1007_s3] ss:$8 sm:$0x3]  ;;  %vm651_vm2 = vcmask 516096  }
  0x18   :  { %v371_v31 = vmul.f32 %v370_v28, %v369_v27  ;;  %v909_v35 = vld [vmem:[%s1007_s3 + $0x4] ss:$8 sm:$0x3]  ;;  %v914_v37 = vld [vmem:[%s1007_s3 + $0x5] ss:$8 sm:$0x3] }
  0x19   :  { %119 = vmatpush1.bf16.msra.mxu0 %v736_v4  ;;  %v105_v18 = vrot.slane %v665_v14, %v891_v13  ;;  %v109_v19 = vrot.slane %v665_v14, %v896_v15  ;;  %v377_v20 = vunpack.c.0.s8 %v376_v17  ;;  %v743_v42 = vld [vmem:[#allocation4 + $0x44] ss:$8 sps:$4 sm:$0xff]   ;;  %v745_v43 = vld [vmem:[#allocation4 + $0x40] ss:$8 sps:$4 sm:$0xff]   ;;  %v746_v44 = vld [vmem:[#allocation4 + $0x54] ss:$8 sps:$4 sm:$0xff]   ;;  %v947_v17 = vrot.slane %v909_v35, %v891_v13 }
  0x1a   :  { %120 = vmatprep.subr.bf16.mxu0 %v737_v5  ;;  %222 = vmatprep.subr.bf16.mxu1 %v743_v42  ;;  %v748_v45 = vld [vmem:[#allocation4 + $0x50] ss:$8 sps:$4 sm:$0xff]   ;;  %v749_v46 = vld [vmem:[#allocation4 + $0x64] ss:$8 sps:$4 sm:$0xff]   ;;  %v751_v47 = vld [vmem:[#allocation4 + $0x60] ss:$8 sps:$4 sm:$0xff]  }
  0x1b   :  { %v380_v25 = vsub.s32 %v377_v20, %v103_v12  ;;  %223 = vmatpush1.bf16.msra.mxu1 %v745_v43  ;;  %v752_v48 = vld [vmem:[#allocation4 + $0x74] ss:$8 sps:$4 sm:$0xff]   ;;  %v754_v49 = vld [vmem:[#allocation4 + $0x70] ss:$8 sps:$4 sm:$0xff]   ;;  %v922_v50 = vld [vmem:[%s1006_s2 + $0x1] sm:$0x1] }
  0x1c   :  { %224 = vmatprep.subr.bf16.mxu1 %v746_v44  ;;  %v757_v51 = vld [vmem:[#allocation4 + $0xc4] ss:$8 sps:$4 sm:$0xff]   ;;  %v157_v52 = vpack.c.bf16 %v922_v50, %v922_v50  ;;  %v755_v53 = vld [vmem:[#allocation4 + $0xc0] ss:$8 sps:$4 sm:$0xff]   ;;  %v760_v54 = vld [vmem:[#allocation4 + $0xd4] ss:$8 sps:$4 sm:$0xff]  }
  0x1d   :  { %121 = vmatpush1.bf16.msra.mxu0 %v739_v6  ;;  %v758_v55 = vld [vmem:[#allocation4 + $0xd0] ss:$8 sps:$4 sm:$0xff]   ;;  %v763_v56 = vld [vmem:[#allocation4 + $0xe4] ss:$8 sps:$4 sm:$0xff]   ;;  %v761_v57 = vld [vmem:[#allocation4 + $0xe0] ss:$8 sps:$4 sm:$0xff]  }
  0x1e   :  { %122 = vmatprep.subr.bf16.mxu0 %v740_v7  ;;  %v766_v58 = vld [vmem:[#allocation4 + $0xf4] ss:$8 sps:$4 sm:$0xff]   ;;  %v764_v59 = vld [vmem:[#allocation4 + $0xf0] ss:$8 sps:$4 sm:$0xff]   ;;  %vm46_vm1 = vcmp.lt.s32.totalorder %v931_v2, 64 }
  0x1f   :  { %225 = vmatpush1.bf16.msra.mxu1 %v748_v45  ;;  %v675_v6 = vld [vmem:[%s1007_s3 + $0x2] ss:$8 sm:$0x3]  ;;  %v787_v42 = vld [vmem:[#allocation4 + $0x124] ss:$8 sps:$4 sm:$0xff]  }
  0x20   :  { %226 = vmatprep.subr.bf16.mxu1 %v749_v46  ;;  %v212_v7 = vrot.slane %v675_v6, %v891_v13  ;;  %v767_v28 = vld [vmem:[#allocation4 + $0x80] ss:$8 sps:$4 sm:$0xff]   ;;  %v790_v44 = vld [vmem:[#allocation4 + $0x134] ss:$8 sps:$4 sm:$0xff]   ;;  %v788_v45 = vld [vmem:[#allocation4 + $0x130] ss:$8 sps:$4 sm:$0xff]  }
  0x21   :  { %123 = vmatpush1.bf16.msra.mxu0 %v742_v8  ;;  %v216_v8 = vrot.slane %v675_v6, %v896_v15  ;;  %v785_v43 = vld [vmem:[#allocation4 + $0x120] ss:$8 sps:$4 sm:$0xff]  }
  0x23   :  { %227 = vmatpush1.bf16.msra.mxu1 %v751_v47 }
  0x24   :  { %674 = vmatmul.mubr.msk.bf16.vlgmr.msra.gmra.mrb[0].mxu0 %vm112_vm0, %v50_v10  ;;  %228 = vmatprep.subr.bf16.mxu1 %v752_v48 }
  0x25   :  { %360 = vmatprep.mubr.bf16.mxu0 %v834_v0 }
  0x27   :  { %229 = vmatpush1.bf16.msra.mxu1 %v754_v49 }
  0x28   :  { %460 = vmatprep.subr.bf16.mxu1 %v757_v51 }
  0x2a   :  { %684 = vmatmul.mubr.msk.bf16.vlgmr.msra.gmra.mrb[0].mxu1 %vm112_vm0, %v157_v52 }
  0x2b   :  { %461 = vmatpush1.bf16.msra.mxu1 %v755_v53  ;;  %492 = vmatprep.mubr.bf16.mxu1 %v834_v0 }
  0x2c   :  { %462 = vmatprep.subr.bf16.mxu1 %v760_v54 }
  0x2f   :  { %463 = vmatpush1.bf16.msra.mxu1 %v758_v55 }
  0x30   :  { %464 = vmatprep.subr.bf16.mxu1 %v763_v56 }
  0x33   :  { %465 = vmatpush1.bf16.msra.mxu1 %v761_v57 }
  0x34   :  { %466 = vmatprep.subr.bf16.mxu1 %v766_v58 }
  0x37   :  { %467 = vmatpush1.bf16.msra.mxu1 %v764_v59 }
  0xf7   :  { %v150_v21 = vpop.f32.mrb[0].mxu0 }
  0xf8   :  { %v151_v22 = vadd.f32 %v150_v21, %v105_v18  ;;  %v152_v23 = vpop.f32.mrb[1].mxu0  ;;  %v951_v18 = vrot.slane %v909_v35, %v896_v15  ;;  %v959_v21 = vrot.slane %v914_v37, %v896_v15 }
  0xf9   :  { %v153_v24 = vadd.f32 %v152_v23, %v109_v19  ;;  %v154_v26 = vpop.f32.mrb[2].mxu0  ;;  %v955_v19 = vrot.slane %v914_v37, %v891_v13 }
  0xfa   :  { %v155_v29 = vpop.f32.mrb[3].mxu0 }
  0xfb   :  { %v374_v30 = vcombine.low %v151_v22, %v153_v24  ;;  %v769_v29 = vld [vmem:[#allocation4 + $0x84] ss:$8 sps:$4 sm:$0xff]  }
  0xfc   :  { %328 = vmatprep.subr.bf16.mxu0 %v769_v29 }
  0xfd   :  { %v381_v32 = vrot.slane %v374_v30, %v380_v25  ;;  %v772_v30 = vld [vmem:[#allocation4 + $0x94] ss:$8 sps:$4 sm:$0xff]   ;;  %329 = vmatpush1.bf16.msra.mxu0 %v767_v28 }
  0xfe   :  { %330 = vmatprep.subr.bf16.mxu0 %v772_v30 }
  0xff   :  { %v388_v33 = vrot.slane %v381_v32, %v380_v25  ;;  %v775_v32 = vld [vmem:[#allocation4 + $0xa4] ss:$8 sps:$4 sm:$0xff]  }
 0x101   :  { %v390_v34 = vadd.f32 %v388_v33, %v371_v31  ;;  %v770_v31 = vld [vmem:[#allocation4 + $0x90] ss:$8 sps:$4 sm:$0xff]   ;;  %v773_v33 = vld [vmem:[#allocation4 + $0xa0] ss:$8 sps:$4 sm:$0xff]  }
 0x102   :  { %331 = vmatpush1.bf16.msra.mxu0 %v770_v31 }
 0x103   :  { %791 = vtanh.f32 %v390_v34  ;;  %332 = vmatprep.subr.bf16.mxu0 %v775_v32  ;;  %v778_v34 = vld [vmem:[#allocation4 + $0xb4] ss:$8 sps:$4 sm:$0xff]  }
 0x106   :  { %333 = vmatpush1.bf16.msra.mxu0 %v773_v33 }
 0x107   :  { %334 = vmatprep.subr.bf16.mxu0 %v778_v34 }
 0x10d   :  { %v792_v36 = vpop.eup %791 }
 0x10e   :  { %v392_v38 = vmul.f32 %v792_v36, %v909_v35  ;;  %v776_v35 = vld [vmem:[#allocation4 + $0xb0] ss:$8 sps:$4 sm:$0xff]   ;;  %v49_v36 = vld [vmem:[%s1006_s2 + $0x2] sm:$0x1] }
 0x10f   :  { %335 = vmatpush1.bf16.msra.mxu0 %v776_v35 }
 0x110   :  { %v393_v39 = vadd.f32 %v914_v37, %v392_v38  ;;  %v781_v37 = vld [vmem:[#allocation4 + $0x104] ss:$8 sps:$4 sm:$0xff]   ;;  %v263_v38 = vpack.c.bf16 %v49_v36, %v49_v36 }
 0x111   :  { %592 = vmatprep.subr.bf16.mxu0 %v781_v37 }
 0x112   :  { %v395_v40 = vrot.slane %v393_v39, 1  ;;  %v398_v60 = vmul.f32 %v393_v39, %v884_v9  ;;  %694 = vmatmul.mubr.msk.bf16.vlgmr.msra.gmra.mrb[4].mxu0 %vm112_vm0, %v263_v38 }
 0x113   :  { %624 = vmatprep.mubr.bf16.mxu0 %v834_v0 }
 0x114   :  { %v397_v41 = vmul.f32 %v395_v40, %v393_v39  ;;  %v779_v39 = vld [vmem:[#allocation4 + $0x100] ss:$8 sps:$4 sm:$0xff]  }
 0x115   :  { %593 = vmatpush1.bf16.msra.mxu0 %v779_v39 }
 0x116   :  { %399 = vrot.lane.b32.xlu0 %v397_v41, %s836_s0  ;;  %v782_v41 = vld [vmem:[#allocation4 + $0x110] ss:$8 sps:$4 sm:$0xff]  }
 0x188   :  { %v400_v61 = vpop.permute.xlu0 %399 }
 0x189   :  { %v401_v62 = vadd.f32 %v400_v61, %v398_v60 }
 0x18b   :  { %793 = vtanh.f32 %v401_v62 }
 0x195   :  { %v794_v63 = vpop.eup %793 }
 0x196   :  { %v403_v1 = vmul.f32 %v794_v63, %v395_v40  ;;  %v784_v40 = vld [vmem:[#allocation4 + $0x114] ss:$8 sps:$4 sm:$0xff]  }
 0x197   :  { %594 = vmatprep.subr.bf16.mxu0 %v784_v40 }
 0x198   :  { %404 = vrot.lane.b32.xlu0 %v403_v1, %s836_s0  ;;  %595 = vmatpush1.bf16.msra.mxu0 %v782_v41 }
 0x199   :  { %596 = vmatprep.subr.bf16.mxu0 %v787_v42 }
 0x19c   :  { %597 = vmatpush1.bf16.msra.mxu0 %v785_v43 }
 0x19d   :  { %598 = vmatprep.subr.bf16.mxu0 %v790_v44 }
 0x1a0   :  { %599 = vmatpush1.bf16.msra.mxu0 %v788_v45 }
 0x20a   :  { %v405_v3 = vpop.permute.xlu0 %404 }
 0x20b   :  { %v406_v4 = vsel %vm46_vm1, %v405_v3, %v401_v62  ;;  %v408_v5 = vpack.c.bf16 %v405_v3, %v405_v3 }
 0x20c   :  { %407 = vst [vmem:[%s1009_s5] sm:$0x1] %v406_v4 }
 0x20d   :  { %703 = vmatmul.mubr.msk.bf16.vlgmr.msra.gmra.mrb[0].mxu1 %vm112_vm0, %v408_v5 }
 0x2e0   :  { %v494_v9 = vpop.f32.mrb[0].mxu1 }
 0x2e1   :  { %v713_v10 = vadd.f32 %v494_v9, %v212_v7  ;;  %v496_v11 = vpop.f32.mrb[1].mxu1 }
 0x2e2   :  { %v714_v12 = vadd.f32 %v496_v11, %v216_v8  ;;  %v498_v14 = vpop.f32.mrb[2].mxu1 }
 0x2e3   :  { %795 = vtanh.f32 %v713_v10  ;;  %v499_v16 = vpop.f32.mrb[3].mxu1  ;;  %v43_v10 = vld [vmem:[%s1007_s3 + $0x6] ss:$0 sm:$0xff] }
 0x2e4   :  { %797 = vtanh.f32 %v714_v12 }
 0x2ed   :  { %v796_v20 = vpop.eup %795 }
 0x2ee   :  { %v798_v22 = vpop.eup %797  ;;  %v514_v23 = vmul.f32 %v796_v20, %v947_v17 }
 0x2ef   :  { %v515_v24 = vmul.f32 %v798_v22, %v951_v18 }
 0x2f0   :  { %v527_v25 = vadd.f32 %v955_v19, %v514_v23 }
 0x2f1   :  { %v528_v26 = vadd.f32 %v959_v21, %v515_v24 }
 0x2f2   :  { %v530_v46 = vmul.f32 %v527_v25, %v922_v50  ;;  %v685_v50 = vld [vmem:[%s1007_s3 + $0x3] ss:$8 sm:$0x3] }
 0x2f3   :  { %v529_v27 = vmul.f32 %v528_v26, %v527_v25  ;;  %v318_v54 = vrot.slane %v685_v50, %v891_v13  ;;  %v322_v55 = vrot.slane %v685_v50, %v896_v15 }
 0x2f5   :  { %531 = vrot.lane.b32.xlu1 %v529_v27, %s836_s0 }
 0x367   :  { %v532_v47 = vpop.permute.xlu1 %531 }
 0x368   :  { %v533_v48 = vadd.f32 %v532_v47, %v530_v46 }
 0x36a   :  { %799 = vtanh.f32 %v533_v48 }
 0x374   :  { %v800_v49 = vpop.eup %799 }
 0x375   :  { %v535_v51 = vmul.f32 %v800_v49, %v528_v26 }
 0x377   :  { %536 = vrot.lane.b32.xlu1 %v535_v51, %s836_s0 }
 0x3e9   :  { %v537_v0 = vpop.permute.xlu1 %536 }
 0x3ea   :  { %v538_v52 = vsel %vm46_vm1, %v537_v0, %v533_v48  ;;  %v540_v53 = vpack.c.bf16 %v537_v0, %v537_v0 }
 0x3eb   :  { %539 = vst [vmem:[%s1009_s5 + $0x1] sm:$0x1] %v538_v52 }
 0x3ec   :  { %712 = vmatmul.mubr.msk.bf16.vlgmr.msra.gmra.mrb[4].mxu0 %vm112_vm0, %v540_v53 }
 0x4bf   :  { %v626_v56 = vpop.f32.mrb[4].mxu0 }
 0x4c0   :  { %v715_v57 = vadd.f32 %v626_v56, %v318_v54  ;;  %v628_v58 = vpop.f32.mrb[5].mxu0 }
 0x4c1   :  { %v716_v59 = vadd.f32 %v628_v58, %v322_v55  ;;  %v630_v60 = vpop.f32.mrb[6].mxu0 }
 0x4c2   :  { %801 = vtanh.f32 %v715_v57  ;;  %v631_v61 = vpop.f32.mrb[7].mxu0 }
 0x4c3   :  { %803 = vtanh.f32 %v716_v59 }
 0x4cc   :  { %v802_v62 = vpop.eup %801 }
 0x4cd   :  { %v804_v63 = vpop.eup %803  ;;  %v635_v1 = vmul.f32 %v802_v62, %v947_v17  ;;  %v655_v17 = vstv %s1005_s1 }
 0x4ce   :  { %v636_v3 = vmul.f32 %v804_v63, %v951_v18 }
 0x4cf   :  { %v637_v4 = vadd.f32 %v635_v1, %v955_v19 }
 0x4d0   :  { %v638_v13 = vadd.f32 %v636_v3, %v959_v21 }
 0x4d1   :  { %v640_v15 = vmul.f32 %v637_v4, %v49_v36 }
 0x4d2   :  { %v639_v5 = vmul.f32 %v638_v13, %v637_v4 }
 0x4d4   :  { %641 = vrot.lane.b32.xlu0 %v639_v5, %s836_s0 }
 0x546   :  { %v642_v6 = vpop.permute.xlu0 %641 }
 0x547   :  { %v643_v7 = vadd.f32 %v642_v6, %v640_v15 }
 0x549   :  { %805 = vtanh.f32 %v643_v7 }
 0x553   :  { %v806_v8 = vpop.eup %805 }
 0x554   :  { %v645_v9 = vmul.f32 %v806_v8, %v638_v13 }
 0x556   :  { %646 = vrot.lane.b32.xlu1 %v645_v9, %s836_s0 }
 0x5c8   :  { %v647_v11 = vpop.permute.xlu1 %646 }
 0x5c9   :  { %v648_v12 = vsel %vm46_vm1, %v647_v11, %v643_v7  ;;  %v650_v14 = vmul.f32 %v647_v11, %v43_v10 }
 0x5ca   :  { %649 = vst [vmem:[%s1009_s5 + $0x2] sm:$0x1] %v648_v12 }
 0x5cb   :  { %v652_v16 = vsel %vm651_vm2, %v650_v14, 0.0 }
 0x5cc   :  { %653 = vadd.xlane.f32.xlu0 %v652_v16 }
 0x659   :  { %v654_v18 = vpop.xlane.xlu0 %653 }
 0x65a   :  { %v656_v19 = vadd.f32 %v655_v17, %v654_v18 }
 0x65c   :  { %657 = vst [vmem:[%s1009_s5 + $0x3] sm:$0x1] %v656_v19 }
 0x65d   :  { %662 = vsyncpa [#allocation5], 1 }

</bundles_post_ra>
